<compile_context>
chip_gen: v5e
topology: v5e:2x2
jax: 0.10.0
libtpu: 0.0.40
codegen_flags: <defaults>
</compile_context>

<pallas_src>
import jax
import jax.numpy as jnp
from jax.experimental import pallas as pl
from jax.experimental.pallas import tpu as pltpu


def _round_up(x, m):
    return (x + m - 1) // m * m


def _pad_feature(d):
    # Small dims -> multiple of 256 (full v6e/v7x MXU width, harmless on v5e);
    # large dims only need 128-lane alignment.
    return _round_up(d, 256 if d < 512 else 128)


def _vmem_capacity_bytes():
    try:
        return int(pltpu.get_tpu_info().vmem_capacity_bytes)
    except Exception:
        return 64 << 20  # conservative fallback: v7x per-TensorCore VMEM


def _mlp_kernel(x_ref, w1_ref, b1_ref, w2_ref, b2_ref, o_ref):
    # fc1 on the MXU with bf16 operands, f32 accumulate: [TM,Dp] @ [Dp,Hp]
    h = jnp.dot(x_ref[...].astype(jnp.bfloat16), w1_ref[...],
                preferred_element_type=jnp.float32)
    # Bias add + ReLU in f32 on the VPU; intermediate stays in vregs
    # (no VMEM scratch round trip).
    h = jnp.maximum(h + b1_ref[...], 0.0)
    # fc2 on the MXU: [TM,Hp] @ [Hp,Cp], bf16 operands, f32 accumulate.
    out = jnp.dot(h.astype(jnp.bfloat16), w2_ref[...],
                  preferred_element_type=jnp.float32)
    o_ref[...] = (out + b2_ref[...]).astype(o_ref.dtype)


def prepare_params(w1, b1, w2, b2):
    """Pad + cast weights once, outside the per-call hot path.

    w1: [D_in, H], b1: [H], w2: [H, C], b2: [C]   (transposed vs. PyTorch)
    Weights -> bf16 (MXU operands); biases -> f32 (f32 epilogue).
    """
    D_in, H = w1.shape
    C = w2.shape[1]
    D_pad, H_pad, C_pad = _pad_feature(D_in), _pad_feature(H), _pad_feature(C)

    w1_p = jnp.zeros((D_pad, H_pad), jnp.bfloat16).at[:D_in, :H].set(
        w1.astype(jnp.bfloat16))
    b1_p = jnp.zeros((1, H_pad), jnp.float32).at[:, :H].set(
        jnp.reshape(b1, (1, H)).astype(jnp.float32))
    w2_p = jnp.zeros((H_pad, C_pad), jnp.bfloat16).at[:H, :C].set(
        w2.astype(jnp.bfloat16))
    b2_p = jnp.zeros((1, C_pad), jnp.float32).at[:, :C].set(
        jnp.reshape(b2, (1, C)).astype(jnp.float32))
    return (w1_p, b1_p, w2_p, b2_p), (D_in, H, C)


def transformer_classifier_forward_prepared(x, prepared, dims, *, block_m=256):
    """Fused fc1 -> ReLU -> fc2 with pre-padded bf16 weights.  x: [B, D_in]."""
    w1_p, b1_p, w2_p, b2_p = prepared
    D_in, H, C = dims
    B = x.shape[0]
    assert x.shape[1] == D_in
    D_pad, H_pad = w1_p.shape
    C_pad = w2_p.shape[1]
    dtype = x.dtype

    # Batch tiling: one tile for small B; at least 2 tiles once B >= 256 so
    # the "parallel" grid axis can shard across both v7x TensorCores.
    if B < 256:
        TM = _round_up(max(B, 8), 8)
        B_pad = TM
    else:
        TM = min(block_m, _round_up(pl.cdiv(B, 2), 8))
        B_pad = _round_up(B, TM)
    grid = (B_pad // TM,)

    # Skip the pad copy when x is already tile/lane aligned.
    if B_pad == B and D_pad == D_in:
        x_p = x
    else:
        x_p = jnp.zeros((B_pad, D_pad), dtype).at[:B, :D_in].set(x)

    # VMEM budget with correct per-operand itemsizes:
    #   bf16 weights + f32 biases single-buffered (resident),
    #   x / out tiles double-buffered (streamed).
    x_isz = jnp.dtype(dtype).itemsize
    est = ((D_pad * H_pad + H_pad * C_pad) * 2        # bf16 weights, 1 buffer
           + (H_pad + C_pad) * 4                      # f32 biases,  1 buffer
           + 2 * TM * D_pad * x_isz                   # x tiles,     2 buffers
           + 2 * TM * C_pad * x_isz)                  # out tiles,   2 buffers
    cap = max(_vmem_capacity_bytes() - (8 << 20), 24 << 20)
    vmem_limit = int(min(max(int(1.5 * est) + (4 << 20), 16 << 20), cap))

    def make_call(single_buffer_weights):
        res = ({"pipeline_mode": pl.Buffered(1)}
               if single_buffer_weights else {})
        return pl.pallas_call(
            _mlp_kernel,
            out_shape=jax.ShapeDtypeStruct((B_pad, C_pad), dtype),
            grid_spec=pltpu.PrefetchScalarGridSpec(
                num_scalar_prefetch=0,
                grid=grid,
                in_specs=[
                    pl.BlockSpec((TM, D_pad), lambda i: (i, 0)),          # streamed
                    pl.BlockSpec((D_pad, H_pad), lambda i: (0, 0), **res),  # resident
                    pl.BlockSpec((1, H_pad), lambda i: (0, 0), **res),       # resident
                    pl.BlockSpec((H_pad, C_pad), lambda i: (0, 0), **res),   # resident
                    pl.BlockSpec((1, C_pad), lambda i: (0, 0), **res),       # resident
                ],
                out_specs=pl.BlockSpec((TM, C_pad), lambda i: (i, 0)),
            ),
            compiler_params=pltpu.CompilerParams(
                dimension_semantics=("parallel",),
                vmem_limit_bytes=vmem_limit),
        )

    try:
        out_p = make_call(True)(x_p, w1_p, b1_p, w2_p, b2_p)
    except Exception:
        # Fallback: default double-buffering if Buffered(1) is unsupported.
        out_p = make_call(False)(x_p, w1_p, b1_p, w2_p, b2_p)

    return out_p[:B, :C]


def transformer_classifier_forward(x, w1, b1, w2, b2, *, block_m=256):
    """Convenience wrapper: pads/casts params per call (prefer prepare_params)."""
    prepared, dims = prepare_params(w1, b1, w2, b2)
    return transformer_classifier_forward_prepared(
        x, prepared, dims, block_m=block_m)


def init_params(key, input_dim, hidden_dim, num_classes, dtype=jnp.float32):
    """Deterministic init mirroring nn.Linear defaults (U(-1/sqrt(fan_in), ..))."""
    k1, k2, k3, k4 = jax.random.split(key, 4)
    bound1 = 1.0 / jnp.sqrt(input_dim)
    bound2 = 1.0 / jnp.sqrt(hidden_dim)
    w1 = jax.random.uniform(k1, (input_dim, hidden_dim), dtype,
                            minval=-bound1, maxval=bound1)
    b1 = jax.random.uniform(k2, (hidden_dim,), dtype,
                            minval=-bound1, maxval=bound1)
    w2 = jax.random.uniform(k3, (hidden_dim, num_classes), dtype,
                            minval=-bound2, maxval=bound2)
    b2 = jax.random.uniform(k4, (num_classes,), dtype,
                            minval=-bound2, maxval=bound2)
    return w1, b1, w2, b2


if __name__ == "__main__":
    # Small shapes consistent with the module's forward pass.
    B, INPUT_DIM, HIDDEN_DIM, NUM_CLASSES = 8, 32, 64, 16

    key = jax.random.PRNGKey(0)
    k_x, k_p = jax.random.split(key)
    x = jax.random.normal(k_x, (B, INPUT_DIM), jnp.float32)
    w1, b1, w2, b2 = init_params(k_p, INPUT_DIM, HIDDEN_DIM, NUM_CLASSES)

    prepared, dims = prepare_params(w1, b1, w2, b2)   # one-time (hoisted) prep
    y = transformer_classifier_forward_prepared(x, prepared, dims)
    y = jax.block_until_ready(y)
    assert y.shape == (B, NUM_CLASSES)

    # bf16-operand reference (same math as the kernel) — tight tolerance.
    h_ref = jnp.maximum(
        jnp.dot(x.astype(jnp.bfloat16), w1.astype(jnp.bfloat16),
                preferred_element_type=jnp.float32) + b1, 0.0)
    ref_bf16 = jnp.dot(h_ref.astype(jnp.bfloat16), w2.astype(jnp.bfloat16),
                       preferred_element_type=jnp.float32) + b2
    assert jnp.allclose(y, ref_bf16, atol=2e-3, rtol=2e-3)

    # Pure f32 reference (the PyTorch module) — relaxed for bf16 MXU operands.
    ref_f32 = jnp.maximum(x @ w1 + b1, 0.0) @ w2 + b2
    assert jnp.allclose(y, ref_f32, atol=5e-2, rtol=5e-2)

    print("KERNEL_OK")
</pallas_src>

<mosaic_0001>
module attributes {stable_mosaic.version = 11 : i64} {
  func.func @_mlp_kernel(%arg0: i32, %arg1: memref<8x256xf32, #tpu.memory_space<vmem>>, %arg2: memref<256x256xbf16, #tpu.memory_space<vmem>>, %arg3: memref<1x256xf32, #tpu.memory_space<vmem>>, %arg4: memref<256x256xbf16, #tpu.memory_space<vmem>>, %arg5: memref<1x256xf32, #tpu.memory_space<vmem>>, %arg6: memref<8x256xf32, #tpu.memory_space<vmem>>) attributes {dimension_semantics = [#tpu.dimension_semantics<parallel>], iteration_bounds = array<i64: 1>, scalar_prefetch = 0 : i64, scratch_operands = 0 : i64, tpu.core_type = #tpu.core_type<tc>, window_params = [{transform_indices = @transform_0, window_bounds = array<i64: 8, 256>}, {pipeline_mode = #tpu.pipeline_mode<synchronous>, transform_indices = @transform_1, window_bounds = array<i64: 256, 256>}, {pipeline_mode = #tpu.pipeline_mode<synchronous>, transform_indices = @transform_2, window_bounds = array<i64: 1, 256>}, {pipeline_mode = #tpu.pipeline_mode<synchronous>, transform_indices = @transform_3, window_bounds = array<i64: 256, 256>}, {pipeline_mode = #tpu.pipeline_mode<synchronous>, transform_indices = @transform_4, window_bounds = array<i64: 1, 256>}, {transform_indices = @transform_5, window_bounds = array<i64: 8, 256>}]} {
    %c0 = arith.constant 0 : index
    %c0_0 = arith.constant 0 : index
    %0 = vector.load %arg1[%c0, %c0_0] : memref<8x256xf32, #tpu.memory_space<vmem>>, vector<8x256xf32>
    %1 = arith.truncf %0 : vector<8x256xf32> to vector<8x256xbf16>
    %c0_1 = arith.constant 0 : index
    %c0_2 = arith.constant 0 : index
    %2 = vector.load %arg2[%c0_1, %c0_2] : memref<256x256xbf16, #tpu.memory_space<vmem>>, vector<256x256xbf16>
    %cst = arith.constant dense<0.000000e+00> : vector<8x256xf32>
    %3 = tpu.matmul %1, %2, %cst {dimension_numbers = #tpu.dot_dimension_numbers<[1], [0], [0], [1], [0, 0, 1, 1], [], []>} : vector<8x256xbf16>, vector<256x256xbf16>, vector<8x256xf32> -> vector<8x256xf32>
    %c0_3 = arith.constant 0 : index
    %c0_4 = arith.constant 0 : index
    %4 = vector.load %arg3[%c0_3, %c0_4] : memref<1x256xf32, #tpu.memory_space<vmem>>, vector<1x256xf32>
    %5 = vector.broadcast %4 : vector<1x256xf32> to vector<8x256xf32>
    %6 = arith.addf %3, %5 : vector<8x256xf32>
    %cst_5 = arith.constant 0.000000e+00 : f32
    %7 = vector.broadcast %cst_5 : f32 to vector<8x256xf32>
    %8 = arith.maximumf %6, %7 : vector<8x256xf32>
    %9 = arith.truncf %8 : vector<8x256xf32> to vector<8x256xbf16>
    %c0_6 = arith.constant 0 : index
    %c0_7 = arith.constant 0 : index
    %10 = vector.load %arg4[%c0_6, %c0_7] : memref<256x256xbf16, #tpu.memory_space<vmem>>, vector<256x256xbf16>
    %cst_8 = arith.constant dense<0.000000e+00> : vector<8x256xf32>
    %11 = tpu.matmul %9, %10, %cst_8 {dimension_numbers = #tpu.dot_dimension_numbers<[1], [0], [0], [1], [0, 0, 1, 1], [], []>} : vector<8x256xbf16>, vector<256x256xbf16>, vector<8x256xf32> -> vector<8x256xf32>
    %c0_9 = arith.constant 0 : index
    %c0_10 = arith.constant 0 : index
    %12 = vector.load %arg5[%c0_9, %c0_10] : memref<1x256xf32, #tpu.memory_space<vmem>>, vector<1x256xf32>
    %13 = vector.broadcast %12 : vector<1x256xf32> to vector<8x256xf32>
    %14 = arith.addf %11, %13 : vector<8x256xf32>
    %c0_11 = arith.constant 0 : index
    %c0_12 = arith.constant 0 : index
    %15 = vector.load %arg6[%c0_11, %c0_12] : memref<8x256xf32, #tpu.memory_space<vmem>>, vector<8x256xf32>
    tpu.vector_store %arg6[%c0_11, %c0_12], %14 {strides = array<i32>} : memref<8x256xf32, #tpu.memory_space<vmem>>, vector<8x256xf32>,
    return
  }
  func.func @transform_0(%arg0: i32) -> (i32, i32) {
    %c0_i32 = arith.constant 0 : i32
    %c0_i32_0 = arith.constant 0 : i32
    return %arg0, %c0_i32 : i32, i32
  }
  func.func @transform_1(%arg0: i32) -> (i32, i32) {
    %c0_i32 = arith.constant 0 : i32
    %c0_i32_0 = arith.constant 0 : i32
    %c0_i32_1 = arith.constant 0 : i32
    return %c0_i32, %c0_i32_0 : i32, i32
  }
  func.func @transform_2(%arg0: i32) -> (i32, i32) {
    %c0_i32 = arith.constant 0 : i32
    %c0_i32_0 = arith.constant 0 : i32
    %c0_i32_1 = arith.constant 0 : i32
    return %c0_i32, %c0_i32_0 : i32, i32
  }
  func.func @transform_3(%arg0: i32) -> (i32, i32) {
    %c0_i32 = arith.constant 0 : i32
    %c0_i32_0 = arith.constant 0 : i32
    %c0_i32_1 = arith.constant 0 : i32
    return %c0_i32, %c0_i32_0 : i32, i32
  }
  func.func @transform_4(%arg0: i32) -> (i32, i32) {
    %c0_i32 = arith.constant 0 : i32
    %c0_i32_0 = arith.constant 0 : i32
    %c0_i32_1 = arith.constant 0 : i32
    return %c0_i32, %c0_i32_0 : i32, i32
  }
  func.func @transform_5(%arg0: i32) -> (i32, i32) {
    %c0_i32 = arith.constant 0 : i32
    %c0_i32_0 = arith.constant 0 : i32
    return %arg0, %c0_i32 : i32, i32
  }
}

module attributes {stable_mosaic.version = 11 : i64} {
  func.func @_mlp_kernel(%arg0: i32, %arg1: memref<8x256xf32, #tpu.memory_space<vmem>>, %arg2: memref<256x256xbf16, #tpu.memory_space<vmem>>, %arg3: memref<1x256xf32, #tpu.memory_space<vmem>>, %arg4: memref<256x256xbf16, #tpu.memory_space<vmem>>, %arg5: memref<1x256xf32, #tpu.memory_space<vmem>>, %arg6: memref<8x256xf32, #tpu.memory_space<vmem>>) attributes {dimension_semantics = [#tpu.dimension_semantics<parallel>], iteration_bounds = array<i64: 1>, scalar_prefetch = 0 : i64, scratch_operands = 0 : i64, tpu.core_type = #tpu.core_type<tc>, window_params = [{transform_indices = @transform_0, window_bounds = array<i64: 8, 256>}, {pipeline_mode = #tpu.pipeline_mode<synchronous>, transform_indices = @transform_1, window_bounds = array<i64: 256, 256>}, {pipeline_mode = #tpu.pipeline_mode<synchronous>, transform_indices = @transform_2, window_bounds = array<i64: 1, 256>}, {pipeline_mode = #tpu.pipeline_mode<synchronous>, transform_indices = @transform_3, window_bounds = array<i64: 256, 256>}, {pipeline_mode = #tpu.pipeline_mode<synchronous>, transform_indices = @transform_4, window_bounds = array<i64: 1, 256>}, {transform_indices = @transform_5, window_bounds = array<i64: 8, 256>}]} {
    %c0 = arith.constant 0 : index
    %c0_0 = arith.constant 0 : index
    %0 = vector.load %arg1[%c0, %c0_0] : memref<8x256xf32, #tpu.memory_space<vmem>>, vector<8x256xf32>
    %1 = arith.truncf %0 : vector<8x256xf32> to vector<8x256xbf16>
    %c0_1 = arith.constant 0 : index
    %c0_2 = arith.constant 0 : index
    %2 = vector.load %arg2[%c0_1, %c0_2] : memref<256x256xbf16, #tpu.memory_space<vmem>>, vector<256x256xbf16>
    %cst = arith.constant dense<0.000000e+00> : vector<8x256xf32>
    %3 = tpu.matmul %1, %2, %cst {dimension_numbers = #tpu.dot_dimension_numbers<[1], [0], [0], [1], [0, 0, 1, 1], [], []>} : vector<8x256xbf16>, vector<256x256xbf16>, vector<8x256xf32> -> vector<8x256xf32>
    %c0_3 = arith.constant 0 : index
    %c0_4 = arith.constant 0 : index
    %4 = vector.load %arg3[%c0_3, %c0_4] : memref<1x256xf32, #tpu.memory_space<vmem>>, vector<1x256xf32>
    %5 = vector.broadcast %4 : vector<1x256xf32> to vector<8x256xf32>
    %6 = arith.addf %3, %5 : vector<8x256xf32>
    %cst_5 = arith.constant 0.000000e+00 : f32
    %7 = vector.broadcast %cst_5 : f32 to vector<8x256xf32>
    %8 = arith.maximumf %6, %7 : vector<8x256xf32>
    %9 = arith.truncf %8 : vector<8x256xf32> to vector<8x256xbf16>
    %c0_6 = arith.constant 0 : index
    %c0_7 = arith.constant 0 : index
    %10 = vector.load %arg4[%c0_6, %c0_7] : memref<256x256xbf16, #tpu.memory_space<vmem>>, vector<256x256xbf16>
    %cst_8 = arith.constant dense<0.000000e+00> : vector<8x256xf32>
    %11 = tpu.matmul %9, %10, %cst_8 {dimension_numbers = #tpu.dot_dimension_numbers<[1], [0], [0], [1], [0, 0, 1, 1], [], []>} : vector<8x256xbf16>, vector<256x256xbf16>, vector<8x256xf32> -> vector<8x256xf32>
    %c0_9 = arith.constant 0 : index
    %c0_10 = arith.constant 0 : index
    %12 = vector.load %arg5[%c0_9, %c0_10] : memref<1x256xf32, #tpu.memory_space<vmem>>, vector<1x256xf32>
    %13 = vector.broadcast %12 : vector<1x256xf32> to vector<8x256xf32>
    %14 = arith.addf %11, %13 : vector<8x256xf32>
    %c0_11 = arith.constant 0 : index
    %c0_12 = arith.constant 0 : index
    %15 = vector.load %arg6[%c0_11, %c0_12] : memref<8x256xf32, #tpu.memory_space<vmem>>, vector<8x256xf32>
    tpu.vector_store %arg6[%c0_11, %c0_12], %14 {strides = array<i32>} : memref<8x256xf32, #tpu.memory_space<vmem>>, vector<8x256xf32>,
    return
  }
  func.func @transform_0(%arg0: i32) -> (i32, i32) {
    %c0_i32 = arith.constant 0 : i32
    %c0_i32_0 = arith.constant 0 : i32
    return %arg0, %c0_i32 : i32, i32
  }
  func.func @transform_1(%arg0: i32) -> (i32, i32) {
    %c0_i32 = arith.constant 0 : i32
    %c0_i32_0 = arith.constant 0 : i32
    %c0_i32_1 = arith.constant 0 : i32
    return %c0_i32, %c0_i32_0 : i32, i32
  }
  func.func @transform_2(%arg0: i32) -> (i32, i32) {
    %c0_i32 = arith.constant 0 : i32
    %c0_i32_0 = arith.constant 0 : i32
    %c0_i32_1 = arith.constant 0 : i32
    return %c0_i32, %c0_i32_0 : i32, i32
  }
  func.func @transform_3(%arg0: i32) -> (i32, i32) {
    %c0_i32 = arith.constant 0 : i32
    %c0_i32_0 = arith.constant 0 : i32
    %c0_i32_1 = arith.constant 0 : i32
    return %c0_i32, %c0_i32_0 : i32, i32
  }
  func.func @transform_4(%arg0: i32) -> (i32, i32) {
    %c0_i32 = arith.constant 0 : i32
    %c0_i32_0 = arith.constant 0 : i32
    %c0_i32_1 = arith.constant 0 : i32
    return %c0_i32, %c0_i32_0 : i32, i32
  }
  func.func @transform_5(%arg0: i32) -> (i32, i32) {
    %c0_i32 = arith.constant 0 : i32
    %c0_i32_0 = arith.constant 0 : i32
    return %arg0, %c0_i32 : i32, i32
  }
}

</mosaic_0001>

<bundles_post_ra>
// kernel: tpu_custom_call.1
= control target key start
LH: loop header
LB: loop body
LE: loop exit
PB: predicated region body
PF: predicated region fallthrough
CT: control target
= control target key end

     0   :  { %10 = vsyncpa [#allocation3], 0  ;;  %s1119_s0 = inlined_call_operand.hbm [shape: f32[8,256], index: 0, kind: input, shape index: {}]   ;;  %s1120_s1 = inlined_call_operand.hbm [shape: bf16[256,256], index: 1, kind: input, shape index: {}]   ;;  %s1121_s2 = inlined_call_operand.hbm [shape: f32[1,256], index: 2, kind: input, shape index: {}]   ;;  %s1122_s3 = inlined_call_operand.hbm [shape: bf16[256,256], index: 3, kind: input, shape index: {}]   ;;  %s1123_s4 = inlined_call_operand.vmem [shape: f32[1,256], index: 4, kind: input, shape index: {}]   ;;  %s1124_s5 = inlined_call_operand.hbm [shape: f32[8,256], index: 5, kind: output, shape index: {}]  }
   0x1   :  { %11 = vsyncpa [#allocation6], 0 }
   0x2   :  { %12 = vsyncpa [#allocation9], 0  ;;  %s29_s20 = sshll.u32 %s1120_s1, 4  ;;  %s30_s20 = int_to_ptr.hbm [resolvable:$true] %s29_s20 }
   0x3   :  { %13 = vsyncpa [#allocation4], 0  ;;  %s1064_s21 = smov [#allocation5]   ;;  %s19_s25 = sshll.u32 %s1119_s0, 4  ;;  %s20_s25 = int_to_ptr.hbm [resolvable:$true] %s19_s25 }
   0x4   :  { %s31_s22 = sshll.u32 %s1064_s21, 4  ;;  %s1065_s26 = smov 128   ;;  %s32_s22 = int_to_ptr.vmem [resolvable:$true] %s31_s22 }
   0x5   :  { %s1066_s27 = smov 8   ;;  %s1067_s28 = smov [#allocation2]  }
   0x6   :  { %37 = dma.hbm_to_vmem [thread:$0]  %s30_s20, 4096, %s32_s22, [#allocation6], %s1065_s26, %s1065_s26, %s1066_s27  }
   0x7   :  { %s21_s29 = sshll.u32 %s1067_s28, 4  ;;  %s43_s7 = sshll.u32 %s1121_s2, 4  ;;  %s22_s29 = int_to_ptr.vmem [resolvable:$true] %s21_s29  ;;  %s44_s7 = int_to_ptr.hbm [resolvable:$true] %s43_s7 }
   0x8   :  { %24 = dma.hbm_to_vmem [thread:$0]  %s20_s25, 256, %s22_s29, [#allocation3]  }
   0x9   :  { %s53_s9 = sshll.u32 %s1122_s3, 4  ;;  %s1068_s10 = smov [#allocation7]   ;;  %s54_s9 = int_to_ptr.hbm [resolvable:$true] %s53_s9 }
   0xa   :  { %s45_s11 = sshll.u32 %s1068_s10, 4  ;;  %s1069_s0 = smov [#allocation8]   ;;  %s46_s11 = int_to_ptr.vmem [resolvable:$true] %s45_s11 }
   0xb   :  { %48 = dma.hbm_to_vmem [thread:$0]  %s44_s7, 32, %s46_s11, [#allocation6]  }
   0xc   :  { %s55_s12 = sshll.u32 %s1069_s0, 4  ;;  %s56_s12 = int_to_ptr.vmem [resolvable:$true] %s55_s12 }
   0xd   :  { %61 = dma.hbm_to_vmem [thread:$0]  %s54_s9, 4096, %s56_s12, [#allocation9], %s1065_s26, %s1065_s26, %s1066_s27  }
   0xe   :  { %1056 = dma.done.wait [#allocation3], 256  }
   0xf   :  { %1057 = vsyncadd [#allocation3], 4294967040 }
  0x10   :  { %1058 = dma.done.wait [#allocation6], 4128  }
  0x11   :  { %1059 = vsyncadd [#allocation6], 4294963168 }
  0x12   :  { %1060 = dma.done.wait [#allocation9], 4096  }
  0x13   :  { %1061 = vsyncadd [#allocation9], 4294963200  ;;  %v667_v0 = vld [vmem:[#allocation5 + $0x70] sm:$0xf]  ;;  %v880_v1 = vld [vmem:[#allocation5 + $0x74] sm:$0xf0] }
  0x14   :  { %v731_v2 = vld [vmem:[#allocation5 + $0xf0] sm:$0xf]  ;;  %v668_v3 = vor.u32 %v880_v1, %v667_v0  ;;  %v896_v4 = vld [vmem:[#allocation5 + $0xf4] sm:$0xf0]  ;;  %v879_v5 = vld [vmem:[#allocation5 + $0x74] sm:$0xf] }
  0x15   :  { %v669_v6 = vld [vmem:[#allocation5 + $0x78] sm:$0xf0]  ;;  %v732_v7 = vor.u32 %v896_v4, %v731_v2  ;;  %v895_v9 = vld [vmem:[#allocation5 + $0xf4] sm:$0xf]  ;;  %v659_v11 = vld [vmem:[#allocation5 + $0x60] sm:$0xf] }
  0x16   :  { %v672_v8 = vor.u32 %v879_v5, %v669_v6  ;;  %v733_v10 = vld [vmem:[#allocation5 + $0xf8] sm:$0xf0]  ;;  %282 = vmatpush.bf16.msra.mxu0 %v668_v3  ;;  %v878_v13 = vld [vmem:[#allocation5 + $0x64] sm:$0xf0]  ;;  %v723_v14 = vld [vmem:[#allocation5 + $0xe0] sm:$0xf] }
  0x17   :  { %v736_v12 = vor.u32 %v895_v9, %v733_v10  ;;  %v894_v15 = vld [vmem:[#allocation5 + $0xe4] sm:$0xf0]  ;;  %295 = vmatpush.bf16.msra.mxu1 %v732_v7  ;;  %v660_v16 = vor.u32 %v878_v13, %v659_v11  ;;  %v877_v18 = vld [vmem:[#allocation5 + $0x64] sm:$0xf]  ;;  %v661_v19 = vld [vmem:[#allocation5 + $0x68] sm:$0xf0] }
  0x18   :  { %308 = vmatpush.bf16.msra.mxu2 %v672_v8  ;;  %v724_v17 = vor.u32 %v894_v15, %v723_v14  ;;  %v893_v20 = vld [vmem:[#allocation5 + $0xe4] sm:$0xf]  ;;  %v664_v21 = vor.u32 %v877_v18, %v661_v19  ;;  %v725_v22 = vld [vmem:[#allocation5 + $0xe8] sm:$0xf0]  ;;  %v651_v23 = vld [vmem:[#allocation5 + $0x50] sm:$0xf] }
  0x19   :  { %321 = vmatpush.bf16.msra.mxu3 %v736_v12  ;;  %v876_v24 = vld [vmem:[#allocation5 + $0x54] sm:$0xf0]  ;;  %v728_v25 = vor.u32 %v893_v20, %v725_v22  ;;  %v715_v26 = vld [vmem:[#allocation5 + $0xd0] sm:$0xf]  ;;  %v875_v28 = vld [vmem:[#allocation5 + $0x54] sm:$0xf] }
  0x1a   :  { %v892_v27 = vld [vmem:[#allocation5 + $0xd4] sm:$0xf0]  ;;  %283 = vmatpush.bf16.msra.mxu0 %v660_v16  ;;  %v652_v29 = vor.u32 %v876_v24, %v651_v23  ;;  %v653_v30 = vld [vmem:[#allocation5 + $0x58] sm:$0xf0]  ;;  %v891_v31 = vld [vmem:[#allocation5 + $0xd4] sm:$0xf] }
  0x1b   :  { %v717_v32 = vld [vmem:[#allocation5 + $0xd8] sm:$0xf0]  ;;  %296 = vmatpush.bf16.msra.mxu1 %v724_v17  ;;  %v716_v33 = vor.u32 %v892_v27, %v715_v26  ;;  %v656_v34 = vor.u32 %v875_v28, %v653_v30  ;;  %v643_v35 = vld [vmem:[#allocation5 + $0x40] sm:$0xf]  ;;  %v874_v36 = vld [vmem:[#allocation5 + $0x44] sm:$0xf0] }
  0x1c   :  { %309 = vmatpush.bf16.msra.mxu2 %v664_v21  ;;  %v707_v37 = vld [vmem:[#allocation5 + $0xc0] sm:$0xf]  ;;  %v720_v38 = vor.u32 %v891_v31, %v717_v32  ;;  %v890_v39 = vld [vmem:[#allocation5 + $0xc4] sm:$0xf0]  ;;  %v873_v40 = vld [vmem:[#allocation5 + $0x44] sm:$0xf]  ;;  %v644_v44 = vor.u32 %v874_v36, %v643_v35 }
  0x1d   :  { %322 = vmatpush.bf16.msra.mxu3 %v728_v25  ;;  %v645_v41 = vld [vmem:[#allocation5 + $0x48] sm:$0xf0]  ;;  %v889_v42 = vld [vmem:[#allocation5 + $0xc4] sm:$0xf]  ;;  %v708_v45 = vor.u32 %v890_v39, %v707_v37  ;;  %v635_v47 = vld [vmem:[#allocation5 + $0x30] sm:$0xf] }
  0x1e   :  { %v709_v43 = vld [vmem:[#allocation5 + $0xc8] sm:$0xf0]  ;;  %284 = vmatpush.bf16.msra.mxu0 %v652_v29  ;;  %v648_v46 = vor.u32 %v873_v40, %v645_v41  ;;  %v872_v48 = vld [vmem:[#allocation5 + $0x34] sm:$0xf0]  ;;  %v699_v49 = vld [vmem:[#allocation5 + $0xb0] sm:$0xf] }
  0x1f   :  { %297 = vmatpush.bf16.msra.mxu1 %v716_v33  ;;  %v712_v50 = vor.u32 %v889_v42, %v709_v43  ;;  %v888_v51 = vld [vmem:[#allocation5 + $0xb4] sm:$0xf0]  ;;  %v871_v52 = vld [vmem:[#allocation5 + $0x34] sm:$0xf]  ;;  %v637_v53 = vld [vmem:[#allocation5 + $0x38] sm:$0xf0]  ;;  %v636_v56 = vor.u32 %v872_v48, %v635_v47 }
  0x20   :  { %310 = vmatpush.bf16.msra.mxu2 %v656_v34  ;;  %v887_v54 = vld [vmem:[#allocation5 + $0xb4] sm:$0xf]  ;;  %v701_v55 = vld [vmem:[#allocation5 + $0xb8] sm:$0xf0]  ;;  %v700_v57 = vor.u32 %v888_v51, %v699_v49  ;;  %v640_v58 = vor.u32 %v871_v52, %v637_v53  ;;  %v627_v59 = vld [vmem:[#allocation5 + $0x20] sm:$0xf] }
  0x21   :  { %323 = vmatpush.bf16.msra.mxu3 %v720_v38  ;;  %v870_v60 = vld [vmem:[#allocation5 + $0x24] sm:$0xf0]  ;;  %v691_v61 = vld [vmem:[#allocation5 + $0xa0] sm:$0xf]  ;;  %v704_v62 = vor.u32 %v887_v54, %v701_v55  ;;  %v869_v0 = vld [vmem:[#allocation5 + $0x24] sm:$0xf] }
  0x22   :  { %285 = vmatpush.bf16.msra.mxu0 %v644_v44  ;;  %v886_v63 = vld [vmem:[#allocation5 + $0xa4] sm:$0xf0]  ;;  %v629_v1 = vld [vmem:[#allocation5 + $0x28] sm:$0xf0]  ;;  %v885_v2 = vld [vmem:[#allocation5 + $0xa4] sm:$0xf]  ;;  %v628_v4 = vor.u32 %v870_v60, %v627_v59 }
  0x23   :  { %298 = vmatpush.bf16.msra.mxu1 %v708_v45  ;;  %v693_v3 = vld [vmem:[#allocation5 + $0xa8] sm:$0xf0]  ;;  %v692_v5 = vor.u32 %v886_v63, %v691_v61  ;;  %v632_v6 = vor.u32 %v869_v0, %v629_v1  ;;  %v619_v7 = vld [vmem:[#allocation5 + $0x10] sm:$0xf]  ;;  %v868_v8 = vld [vmem:[#allocation5 + $0x14] sm:$0xf0] }
  0x24   :  { %311 = vmatpush.bf16.msra.mxu2 %v648_v46  ;;  %v683_v9 = vld [vmem:[#allocation5 + $0x90] sm:$0xf]  ;;  %v696_v10 = vor.u32 %v885_v2, %v693_v3  ;;  %v884_v11 = vld [vmem:[#allocation5 + $0x94] sm:$0xf0]  ;;  %v867_v12 = vld [vmem:[#allocation5 + $0x14] sm:$0xf]  ;;  %v620_v16 = vor.u32 %v868_v8, %v619_v7 }
  0x25   :  { %324 = vmatpush.bf16.msra.mxu3 %v712_v50  ;;  %v621_v13 = vld [vmem:[#allocation5 + $0x18] sm:$0xf0]  ;;  %v883_v14 = vld [vmem:[#allocation5 + $0x94] sm:$0xf]  ;;  %v611_v17 = vld [vmem:[#allocation5] sm:$0xf]  ;;  %v684_v18 = vor.u32 %v884_v11, %v683_v9 }
  0x26   :  { %286 = vmatpush.bf16.msra.mxu0 %v636_v56  ;;  %v685_v15 = vld [vmem:[#allocation5 + $0x98] sm:$0xf0]  ;;  %v624_v19 = vor.u32 %v867_v12, %v621_v13  ;;  %v866_v20 = vld [vmem:[#allocation5 + $0x4] sm:$0xf0]  ;;  %v675_v21 = vld [vmem:[#allocation5 + $0x80] sm:$0xf] }
  0x27   :  { %299 = vmatpush.bf16.msra.mxu1 %v700_v57  ;;  %v882_v22 = vld [vmem:[#allocation5 + $0x84] sm:$0xf0]  ;;  %v688_v23 = vor.u32 %v883_v14, %v685_v15  ;;  %v865_v24 = vld [vmem:[#allocation5 + $0x4] sm:$0xf]  ;;  %v613_v25 = vld [vmem:[#allocation5 + $0x8] sm:$0xf0]  ;;  %v612_v30 = vor.u32 %v866_v20, %v611_v17 }
  0x28   :  { %312 = vmatpush.bf16.msra.mxu2 %v640_v58  ;;  %v881_v26 = vld [vmem:[#allocation5 + $0x84] sm:$0xf]  ;;  %v677_v27 = vld [vmem:[#allocation5 + $0x88] sm:$0xf0]  ;;  %v795_v28 = vld [vmem:[#allocation8 + $0x70] sm:$0xf]  ;;  %v676_v34 = vor.u32 %v882_v22, %v675_v21  ;;  %v616_v35 = vor.u32 %v865_v24, %v613_v25 }
  0x29   :  { %325 = vmatpush.bf16.msra.mxu3 %v704_v62  ;;  %v912_v29 = vld [vmem:[#allocation8 + $0x74] sm:$0xf0]  ;;  %v80_v31 = vld [vmem:[#allocation2] sm:$0xff]  ;;  %v797_v33 = vld [vmem:[#allocation8 + $0x78] sm:$0xf0]  ;;  %v680_v37 = vor.u32 %v881_v26, %v677_v27  ;;  %s1070_s13 = smov [#allocation10]  }
  0x2a   :  { %287 = vmatpush.bf16.msra.mxu0 %v628_v4  ;;  %v911_v32 = vld [vmem:[#allocation8 + $0x74] sm:$0xf]  ;;  %v796_v38 = vor.u32 %v912_v29, %v795_v28  ;;  %v787_v39 = vld [vmem:[#allocation8 + $0x60] sm:$0xf]  ;;  %v859_v40 = vld [vmem:[#allocation8 + $0xf0] sm:$0xf]  ;;  %v82_v42 = vpack.c.bf16 %v80_v31, %v80_v31 }
  0x2b   :  { %300 = vmatpush.bf16.msra.mxu1 %v692_v5  ;;  %v81_v36 = vld [vmem:[#allocation2 + $0x8] sm:$0xff]  ;;  %v800_v43 = vor.u32 %v911_v32, %v797_v33  ;;  %v910_v44 = vld [vmem:[#allocation8 + $0x64] sm:$0xf0]  ;;  %v909_v48 = vld [vmem:[#allocation8 + $0x64] sm:$0xf]  ;;  %s595_s14 = sshll.u32 %s1070_s13, 4  ;;  %s596_s14 = int_to_ptr.vmem [resolvable:$true] %s595_s14 }
  0x2c   :  { %313 = vmatpush.bf16.msra.mxu2 %v632_v6  ;;  %v928_v41 = vld [vmem:[#allocation8 + $0xf4] sm:$0xf0]  ;;  %v927_v45 = vld [vmem:[#allocation8 + $0xf4] sm:$0xf]  ;;  %v861_v46 = vld [vmem:[#allocation8 + $0xf8] sm:$0xf0]  ;;  %v83_v47 = vpack.c.bf16 %v81_v36, %v81_v36  ;;  %v788_v51 = vor.u32 %v910_v44, %v787_v39 }
  0x2d   :  { %326 = vmatpush.bf16.msra.mxu3 %v696_v10  ;;  %v789_v49 = vld [vmem:[#allocation8 + $0x68] sm:$0xf0]  ;;  %v860_v50 = vor.u32 %v928_v41, %v859_v40  ;;  %v864_v52 = vor.u32 %v927_v45, %v861_v46  ;;  %v779_v53 = vld [vmem:[#allocation8 + $0x50] sm:$0xf]  ;;  %v851_v54 = vld [vmem:[#allocation8 + $0xe0] sm:$0xf] }
  0x2e   :  { %288 = vmatpush.bf16.msra.mxu0 %v620_v16  ;;  %v926_v55 = vld [vmem:[#allocation8 + $0xe4] sm:$0xf0]  ;;  %v792_v56 = vor.u32 %v909_v48, %v789_v49  ;;  %v908_v57 = vld [vmem:[#allocation8 + $0x54] sm:$0xf0]  ;;  %v925_v58 = vld [vmem:[#allocation8 + $0xe4] sm:$0xf] }
  0x2f   :  { %301 = vmatpush.bf16.msra.mxu1 %v684_v18  ;;  %v853_v59 = vld [vmem:[#allocation8 + $0xe8] sm:$0xf0]  ;;  %v907_v60 = vld [vmem:[#allocation8 + $0x54] sm:$0xf]  ;;  %v781_v61 = vld [vmem:[#allocation8 + $0x58] sm:$0xf0]  ;;  %v852_v62 = vor.u32 %v926_v55, %v851_v54  ;;  %v780_v63 = vor.u32 %v908_v57, %v779_v53 }
  0x30   :  { %314 = vmatpush.bf16.msra.mxu2 %v624_v19  ;;  %v856_v0 = vor.u32 %v925_v58, %v853_v59  ;;  %v771_v1 = vld [vmem:[#allocation8 + $0x40] sm:$0xf]  ;;  %v843_v2 = vld [vmem:[#allocation8 + $0xd0] sm:$0xf]  ;;  %v924_v3 = vld [vmem:[#allocation8 + $0xd4] sm:$0xf0]  ;;  %v784_v4 = vor.u32 %v907_v60, %v781_v61 }
  0x31   :  { %327 = vmatpush.bf16.msra.mxu3 %v688_v23  ;;  %v906_v5 = vld [vmem:[#allocation8 + $0x44] sm:$0xf0]  ;;  %v923_v6 = vld [vmem:[#allocation8 + $0xd4] sm:$0xf]  ;;  %v845_v7 = vld [vmem:[#allocation8 + $0xd8] sm:$0xf0]  ;;  %v844_v10 = vor.u32 %v924_v3, %v843_v2 }
  0x32   :  { %289 = vmatpush.bf16.msra.mxu0 %v612_v30  ;;  %v905_v8 = vld [vmem:[#allocation8 + $0x44] sm:$0xf]  ;;  %v773_v9 = vld [vmem:[#allocation8 + $0x48] sm:$0xf0]  ;;  %v772_v11 = vor.u32 %v906_v5, %v771_v1  ;;  %v848_v12 = vor.u32 %v923_v6, %v845_v7  ;;  %v763_v13 = vld [vmem:[#allocation8 + $0x30] sm:$0xf] }
  0x33   :  { %302 = vmatpush.bf16.msra.mxu1 %v676_v34  ;;  %v835_v14 = vld [vmem:[#allocation8 + $0xc0] sm:$0xf]  ;;  %v922_v15 = vld [vmem:[#allocation8 + $0xc4] sm:$0xf0]  ;;  %v776_v16 = vor.u32 %v905_v8, %v773_v9  ;;  %v904_v17 = vld [vmem:[#allocation8 + $0x34] sm:$0xf0] }
  0x34   :  { %315 = vmatpush.bf16.msra.mxu2 %v616_v35  ;;  %v921_v18 = vld [vmem:[#allocation8 + $0xc4] sm:$0xf]  ;;  %v837_v19 = vld [vmem:[#allocation8 + $0xc8] sm:$0xf0]  ;;  %v903_v20 = vld [vmem:[#allocation8 + $0x34] sm:$0xf]  ;;  %v836_v22 = vor.u32 %v922_v15, %v835_v14  ;;  %v764_v23 = vor.u32 %v904_v17, %v763_v13 }
  0x35   :  { %328 = vmatpush.bf16.msra.mxu3 %v680_v37  ;;  %290 = vmatmul.bf16.vlgmr.msra.gmra.mxu0 %v82_v42  ;;  %v765_v21 = vld [vmem:[#allocation8 + $0x38] sm:$0xf0]  ;;  %v840_v24 = vor.u32 %v921_v18, %v837_v19  ;;  %v755_v26 = vld [vmem:[#allocation8 + $0x20] sm:$0xf]  ;;  %v902_v27 = vld [vmem:[#allocation8 + $0x24] sm:$0xf0] }
  0x36   :  { %536 = vmatpush.bf16.msrb.mxu0 %v796_v38  ;;  %303 = vmatmul.bf16.vlgmr.msra.gmra.mxu1 %v83_v47  ;;  %v768_v25 = vor.u32 %v903_v20, %v765_v21  ;;  %v901_v28 = vld [vmem:[#allocation8 + $0x24] sm:$0xf]  ;;  %v757_v29 = vld [vmem:[#allocation8 + $0x28] sm:$0xf0]  ;;  %v756_v30 = vor.u32 %v902_v27, %v755_v26  ;;  %v827_v32 = vld [vmem:[#allocation8 + $0xb0] sm:$0xf] }
  0x37   :  { %316 = vmatmul.bf16.vlgmr.msra.gmra.mxu2 %v82_v42  ;;  %549 = vmatpush.bf16.msrb.mxu1 %v860_v50  ;;  %v760_v31 = vor.u32 %v901_v28, %v757_v29  ;;  %v920_v33 = vld [vmem:[#allocation8 + $0xb4] sm:$0xf0]  ;;  %v919_v34 = vld [vmem:[#allocation8 + $0xb4] sm:$0xf]  ;;  %v829_v36 = vld [vmem:[#allocation8 + $0xb8] sm:$0xf0] }
  0x38   :  { %562 = vmatpush.bf16.msrb.mxu2 %v800_v43  ;;  %329 = vmatmul.bf16.vlgmr.msra.gmra.mxu3 %v83_v47  ;;  %v828_v35 = vor.u32 %v920_v33, %v827_v32  ;;  %v832_v37 = vor.u32 %v919_v34, %v829_v36  ;;  %v747_v38 = vld [vmem:[#allocation8 + $0x10] sm:$0xf]  ;;  %v900_v39 = vld [vmem:[#allocation8 + $0x14] sm:$0xf0]  ;;  %v899_v40 = vld [vmem:[#allocation8 + $0x14] sm:$0xf] }
  0x39   :  { %575 = vmatpush.bf16.msrb.mxu3 %v864_v52  ;;  %v748_v41 = vor.u32 %v900_v39, %v747_v38  ;;  %v749_v42 = vld [vmem:[#allocation8 + $0x18] sm:$0xf0]  ;;  %v819_v44 = vld [vmem:[#allocation8 + $0xa0] sm:$0xf]  ;;  %v918_v45 = vld [vmem:[#allocation8 + $0xa4] sm:$0xf0] }
  0x3a   :  { %537 = vmatpush.bf16.msrb.mxu0 %v788_v51  ;;  %v752_v43 = vor.u32 %v899_v40, %v749_v42  ;;  %v917_v46 = vld [vmem:[#allocation8 + $0xa4] sm:$0xf]  ;;  %v820_v47 = vor.u32 %v918_v45, %v819_v44  ;;  %v821_v48 = vld [vmem:[#allocation8 + $0xa8] sm:$0xf0]  ;;  %v739_v50 = vld [vmem:[#allocation8] sm:$0xf] }
  0x3b   :  { %550 = vmatpush.bf16.msrb.mxu1 %v852_v62  ;;  %v824_v49 = vor.u32 %v917_v46, %v821_v48  ;;  %v898_v51 = vld [vmem:[#allocation8 + $0x4] sm:$0xf0]  ;;  %v897_v52 = vld [vmem:[#allocation8 + $0x4] sm:$0xf]  ;;  %v741_v54 = vld [vmem:[#allocation8 + $0x8] sm:$0xf0] }
  0x3c   :  { %563 = vmatpush.bf16.msrb.mxu2 %v792_v56  ;;  %v740_v53 = vor.u32 %v898_v51, %v739_v50  ;;  %v744_v55 = vor.u32 %v897_v52, %v741_v54  ;;  %v811_v56 = vld [vmem:[#allocation8 + $0x90] sm:$0xf]  ;;  %v916_v57 = vld [vmem:[#allocation8 + $0x94] sm:$0xf0]  ;;  %v915_v59 = vld [vmem:[#allocation8 + $0x94] sm:$0xf] }
  0x3d   :  { %576 = vmatpush.bf16.msrb.mxu3 %v856_v0  ;;  %v812_v58 = vor.u32 %v916_v57, %v811_v56  ;;  %v813_v60 = vld [vmem:[#allocation8 + $0x98] sm:$0xf0]  ;;  %v803_v62 = vld [vmem:[#allocation8 + $0x80] sm:$0xf]  ;;  %v913_v0 = vld [vmem:[#allocation8 + $0x84] sm:$0xf] }
  0x3e   :  { %538 = vmatpush.bf16.msrb.mxu0 %v780_v63  ;;  %v816_v61 = vor.u32 %v915_v59, %v813_v60  ;;  %v914_v63 = vld [vmem:[#allocation8 + $0x84] sm:$0xf0]  ;;  %v805_v2 = vld [vmem:[#allocation8 + $0x88] sm:$0xf0]  ;;  %s597_s17 = sshll.u32 %s1124_s5, 4  ;;  %s598_s17 = int_to_ptr.hbm [resolvable:$true] %s597_s17 }
  0x3f   :  { %551 = vmatpush.bf16.msrb.mxu1 %v844_v10  ;;  %v804_v1 = vor.u32 %v914_v63, %v803_v62  ;;  %v808_v3 = vor.u32 %v913_v0, %v805_v2 }
  0x40   :  { %564 = vmatpush.bf16.msrb.mxu2 %v784_v4  ;;  %v116_v4 = vld [vmem:[#allocation7] sm:$0x3] }
  0x41   :  { %577 = vmatpush.bf16.msrb.mxu3 %v848_v12  ;;  %v118_v5 = vperm.slane %v116_v4, 0  ;;  %v119_v10 = vperm.slane %v116_v4, 1 }
  0x42   :  { %539 = vmatpush.bf16.msrb.mxu0 %v772_v11 }
  0x43   :  { %552 = vmatpush.bf16.msrb.mxu1 %v836_v22 }
  0x44   :  { %565 = vmatpush.bf16.msrb.mxu2 %v776_v16 }
  0x45   :  { %578 = vmatpush.bf16.msrb.mxu3 %v840_v24 }
  0x46   :  { %540 = vmatpush.bf16.msrb.mxu0 %v764_v23  ;;  %v370_v23 = vld [vmem:[%s1123_s4] sm:$0x3] }
  0x47   :  { %553 = vmatpush.bf16.msrb.mxu1 %v828_v35  ;;  %v372_v24 = vperm.slane %v370_v23, 0  ;;  %v373_v27 = vperm.slane %v370_v23, 1 }
  0x48   :  { %566 = vmatpush.bf16.msrb.mxu2 %v768_v25 }
  0x49   :  { %579 = vmatpush.bf16.msrb.mxu3 %v832_v37 }
  0x4a   :  { %541 = vmatpush.bf16.msrb.mxu0 %v756_v30 }
  0x4b   :  { %554 = vmatpush.bf16.msrb.mxu1 %v820_v47 }
  0x4c   :  { %567 = vmatpush.bf16.msrb.mxu2 %v760_v31 }
  0x4d   :  { %580 = vmatpush.bf16.msrb.mxu3 %v824_v49 }
  0x4e   :  { %542 = vmatpush.bf16.msrb.mxu0 %v748_v41 }
  0x4f   :  { %555 = vmatpush.bf16.msrb.mxu1 %v812_v58 }
  0x50   :  { %568 = vmatpush.bf16.msrb.mxu2 %v752_v43 }
  0x51   :  { %581 = vmatpush.bf16.msrb.mxu3 %v816_v61 }
  0x52   :  { %543 = vmatpush.bf16.msrb.mxu0 %v740_v53 }
  0x53   :  { %556 = vmatpush.bf16.msrb.mxu1 %v804_v1 }
  0x54   :  { %569 = vmatpush.bf16.msrb.mxu2 %v744_v55 }
  0x55   :  { %582 = vmatpush.bf16.msrb.mxu3 %v808_v3 }
  0xb2   :  { %v291_v6 = vpop.f32.mrf.mxu0 }
  0xb3   :  { %v292_v7 = vadd.f32 %v291_v6, %v118_v5  ;;  %v304_v8 = vpop.f32.mrf.mxu1 }
  0xb5   :  { %v305_v9 = vadd.f32 %v304_v8, %v292_v7 }
  0xb7   :  { %v334_v11 = vmax.f32 %v305_v9, 0.0 }
  0xb9   :  { %v336_v12 = vpack.c.bf16 %v334_v11, %v334_v11 }
  0xba   :  { %v317_v13 = vpop.f32.mrf.mxu2  ;;  %v293_v16 = vpop.f32.mrf.mxu0 }
  0xbb   :  { %v318_v14 = vadd.f32 %v317_v13, %v119_v10  ;;  %v330_v15 = vpop.f32.mrf.mxu3  ;;  %v306_v17 = vpop.f32.mrf.mxu1  ;;  %544 = vmatmul.bf16.vlgmr.msrb.gmra.mxu0 %v336_v12  ;;  %570 = vmatmul.bf16.vlgmr.msrb.gmra.mxu2 %v336_v12 }
  0xbd   :  { %v331_v18 = vadd.f32 %v330_v15, %v318_v14 }
  0xbf   :  { %v335_v19 = vmax.f32 %v331_v18, 0.0 }
  0xc1   :  { %v337_v20 = vpack.c.bf16 %v335_v19, %v335_v19 }
  0xc2   :  { %v319_v21 = vpop.f32.mrf.mxu2 }
  0xc3   :  { %v332_v22 = vpop.f32.mrf.mxu3  ;;  %557 = vmatmul.bf16.vlgmr.msrb.gmra.mxu1 %v337_v20  ;;  %583 = vmatmul.bf16.vlgmr.msrb.gmra.mxu3 %v337_v20 }
 0x138   :  { %v545_v25 = vpop.f32.mrf.mxu0 }
 0x139   :  { %v546_v26 = vadd.f32 %v545_v25, %v372_v24 }
 0x13e   :  { %v571_v28 = vpop.f32.mrf.mxu2 }
 0x13f   :  { %v572_v32 = vadd.f32 %v571_v28, %v373_v27 }
 0x140   :  { %v558_v29 = vpop.f32.mrf.mxu1  ;;  %v547_v31 = vpop.f32.mrf.mxu0 }
 0x141   :  { %v559_v30 = vadd.f32 %v558_v29, %v546_v26 }
 0x143   :  { %588 = vst [vmem:[#allocation10] sm:$0xff] %v559_v30 }
 0x146   :  { %v584_v33 = vpop.f32.mrf.mxu3  ;;  %v573_v35 = vpop.f32.mrf.mxu2 }
 0x147   :  { %v585_v34 = vadd.f32 %v584_v33, %v572_v32 }
 0x148   :  { %v560_v36 = vpop.f32.mrf.mxu1 }
 0x149   :  { %589 = vst [vmem:[#allocation10 + $0x8] sm:$0xff] %v585_v34 }
 0x14a   :  { %600 = dma.vmem_to_hbm [thread:$0]  %s596_s14, 256, %s598_s17, [#allocation4]  }
 0x14e   :  { %v586_v37 = vpop.f32.mrf.mxu3 }
 0x14f   :  { %1062 = dma.done.wait [#allocation4], 256  }
 0x150   :  { %1063 = vsyncadd [#allocation4], 4294967040 }
 0x151   :  { %605 = vsyncpa [#allocation3], 1 }
 0x152   :  { %606 = vsyncpa [#allocation6], 1 }
 0x153   :  { %607 = vsyncpa [#allocation9], 1 }
 0x154   :  { %608 = vsyncpa [#allocation4], 1 }

// kernel: tpu_custom_call.1
= control target key start
LH: loop header
LB: loop body
LE: loop exit
PB: predicated region body
PF: predicated region fallthrough
CT: control target
= control target key end

     0   :  { %10 = vsyncpa [#allocation3], 0  ;;  %s1119_s0 = inlined_call_operand.hbm [shape: f32[8,256], index: 0, kind: input, shape index: {}]   ;;  %s1120_s1 = inlined_call_operand.hbm [shape: bf16[256,256], index: 1, kind: input, shape index: {}]   ;;  %s1121_s2 = inlined_call_operand.hbm [shape: f32[1,256], index: 2, kind: input, shape index: {}]   ;;  %s1122_s3 = inlined_call_operand.hbm [shape: bf16[256,256], index: 3, kind: input, shape index: {}]   ;;  %s1123_s4 = inlined_call_operand.vmem [shape: f32[1,256], index: 4, kind: input, shape index: {}]   ;;  %s1124_s5 = inlined_call_operand.hbm [shape: f32[8,256], index: 5, kind: output, shape index: {}]  }
   0x1   :  { %11 = vsyncpa [#allocation6], 0 }
   0x2   :  { %12 = vsyncpa [#allocation9], 0  ;;  %s29_s20 = sshll.u32 %s1120_s1, 4  ;;  %s30_s20 = int_to_ptr.hbm [resolvable:$true] %s29_s20 }
   0x3   :  { %13 = vsyncpa [#allocation4], 0  ;;  %s1064_s21 = smov [#allocation5]   ;;  %s19_s25 = sshll.u32 %s1119_s0, 4  ;;  %s20_s25 = int_to_ptr.hbm [resolvable:$true] %s19_s25 }
   0x4   :  { %s31_s22 = sshll.u32 %s1064_s21, 4  ;;  %s1065_s26 = smov 128   ;;  %s32_s22 = int_to_ptr.vmem [resolvable:$true] %s31_s22 }
   0x5   :  { %s1066_s27 = smov 8   ;;  %s1067_s28 = smov [#allocation2]  }
   0x6   :  { %37 = dma.hbm_to_vmem [thread:$0]  %s30_s20, 4096, %s32_s22, [#allocation6], %s1065_s26, %s1065_s26, %s1066_s27  }
   0x7   :  { %s21_s29 = sshll.u32 %s1067_s28, 4  ;;  %s43_s7 = sshll.u32 %s1121_s2, 4  ;;  %s22_s29 = int_to_ptr.vmem [resolvable:$true] %s21_s29  ;;  %s44_s7 = int_to_ptr.hbm [resolvable:$true] %s43_s7 }
   0x8   :  { %24 = dma.hbm_to_vmem [thread:$0]  %s20_s25, 256, %s22_s29, [#allocation3]  }
   0x9   :  { %s53_s9 = sshll.u32 %s1122_s3, 4  ;;  %s1068_s10 = smov [#allocation7]   ;;  %s54_s9 = int_to_ptr.hbm [resolvable:$true] %s53_s9 }
   0xa   :  { %s45_s11 = sshll.u32 %s1068_s10, 4  ;;  %s1069_s0 = smov [#allocation8]   ;;  %s46_s11 = int_to_ptr.vmem [resolvable:$true] %s45_s11 }
   0xb   :  { %48 = dma.hbm_to_vmem [thread:$0]  %s44_s7, 32, %s46_s11, [#allocation6]  }
   0xc   :  { %s55_s12 = sshll.u32 %s1069_s0, 4  ;;  %s56_s12 = int_to_ptr.vmem [resolvable:$true] %s55_s12 }
   0xd   :  { %61 = dma.hbm_to_vmem [thread:$0]  %s54_s9, 4096, %s56_s12, [#allocation9], %s1065_s26, %s1065_s26, %s1066_s27  }
   0xe   :  { %1056 = dma.done.wait [#allocation3], 256  }
   0xf   :  { %1057 = vsyncadd [#allocation3], 4294967040 }
  0x10   :  { %1058 = dma.done.wait [#allocation6], 4128  }
  0x11   :  { %1059 = vsyncadd [#allocation6], 4294963168 }
  0x12   :  { %1060 = dma.done.wait [#allocation9], 4096  }
  0x13   :  { %1061 = vsyncadd [#allocation9], 4294963200  ;;  %v667_v0 = vld [vmem:[#allocation5 + $0x70] sm:$0xf]  ;;  %v880_v1 = vld [vmem:[#allocation5 + $0x74] sm:$0xf0] }
  0x14   :  { %v731_v2 = vld [vmem:[#allocation5 + $0xf0] sm:$0xf]  ;;  %v668_v3 = vor.u32 %v880_v1, %v667_v0  ;;  %v896_v4 = vld [vmem:[#allocation5 + $0xf4] sm:$0xf0]  ;;  %v879_v5 = vld [vmem:[#allocation5 + $0x74] sm:$0xf] }
  0x15   :  { %v669_v6 = vld [vmem:[#allocation5 + $0x78] sm:$0xf0]  ;;  %v732_v7 = vor.u32 %v896_v4, %v731_v2  ;;  %v895_v9 = vld [vmem:[#allocation5 + $0xf4] sm:$0xf]  ;;  %v659_v11 = vld [vmem:[#allocation5 + $0x60] sm:$0xf] }
  0x16   :  { %v672_v8 = vor.u32 %v879_v5, %v669_v6  ;;  %v733_v10 = vld [vmem:[#allocation5 + $0xf8] sm:$0xf0]  ;;  %282 = vmatpush.bf16.msra.mxu0 %v668_v3  ;;  %v878_v13 = vld [vmem:[#allocation5 + $0x64] sm:$0xf0]  ;;  %v723_v14 = vld [vmem:[#allocation5 + $0xe0] sm:$0xf] }
  0x17   :  { %v736_v12 = vor.u32 %v895_v9, %v733_v10  ;;  %v894_v15 = vld [vmem:[#allocation5 + $0xe4] sm:$0xf0]  ;;  %295 = vmatpush.bf16.msra.mxu1 %v732_v7  ;;  %v660_v16 = vor.u32 %v878_v13, %v659_v11  ;;  %v877_v18 = vld [vmem:[#allocation5 + $0x64] sm:$0xf]  ;;  %v661_v19 = vld [vmem:[#allocation5 + $0x68] sm:$0xf0] }
  0x18   :  { %308 = vmatpush.bf16.msra.mxu2 %v672_v8  ;;  %v724_v17 = vor.u32 %v894_v15, %v723_v14  ;;  %v893_v20 = vld [vmem:[#allocation5 + $0xe4] sm:$0xf]  ;;  %v664_v21 = vor.u32 %v877_v18, %v661_v19  ;;  %v725_v22 = vld [vmem:[#allocation5 + $0xe8] sm:$0xf0]  ;;  %v651_v23 = vld [vmem:[#allocation5 + $0x50] sm:$0xf] }
  0x19   :  { %321 = vmatpush.bf16.msra.mxu3 %v736_v12  ;;  %v876_v24 = vld [vmem:[#allocation5 + $0x54] sm:$0xf0]  ;;  %v728_v25 = vor.u32 %v893_v20, %v725_v22  ;;  %v715_v26 = vld [vmem:[#allocation5 + $0xd0] sm:$0xf]  ;;  %v875_v28 = vld [vmem:[#allocation5 + $0x54] sm:$0xf] }
  0x1a   :  { %v892_v27 = vld [vmem:[#allocation5 + $0xd4] sm:$0xf0]  ;;  %283 = vmatpush.bf16.msra.mxu0 %v660_v16  ;;  %v652_v29 = vor.u32 %v876_v24, %v651_v23  ;;  %v653_v30 = vld [vmem:[#allocation5 + $0x58] sm:$0xf0]  ;;  %v891_v31 = vld [vmem:[#allocation5 + $0xd4] sm:$0xf] }
  0x1b   :  { %v717_v32 = vld [vmem:[#allocation5 + $0xd8] sm:$0xf0]  ;;  %296 = vmatpush.bf16.msra.mxu1 %v724_v17  ;;  %v716_v33 = vor.u32 %v892_v27, %v715_v26  ;;  %v656_v34 = vor.u32 %v875_v28, %v653_v30  ;;  %v643_v35 = vld [vmem:[#allocation5 + $0x40] sm:$0xf]  ;;  %v874_v36 = vld [vmem:[#allocation5 + $0x44] sm:$0xf0] }
  0x1c   :  { %309 = vmatpush.bf16.msra.mxu2 %v664_v21  ;;  %v707_v37 = vld [vmem:[#allocation5 + $0xc0] sm:$0xf]  ;;  %v720_v38 = vor.u32 %v891_v31, %v717_v32  ;;  %v890_v39 = vld [vmem:[#allocation5 + $0xc4] sm:$0xf0]  ;;  %v873_v40 = vld [vmem:[#allocation5 + $0x44] sm:$0xf]  ;;  %v644_v44 = vor.u32 %v874_v36, %v643_v35 }
  0x1d   :  { %322 = vmatpush.bf16.msra.mxu3 %v728_v25  ;;  %v645_v41 = vld [vmem:[#allocation5 + $0x48] sm:$0xf0]  ;;  %v889_v42 = vld [vmem:[#allocation5 + $0xc4] sm:$0xf]  ;;  %v708_v45 = vor.u32 %v890_v39, %v707_v37  ;;  %v635_v47 = vld [vmem:[#allocation5 + $0x30] sm:$0xf] }
  0x1e   :  { %v709_v43 = vld [vmem:[#allocation5 + $0xc8] sm:$0xf0]  ;;  %284 = vmatpush.bf16.msra.mxu0 %v652_v29  ;;  %v648_v46 = vor.u32 %v873_v40, %v645_v41  ;;  %v872_v48 = vld [vmem:[#allocation5 + $0x34] sm:$0xf0]  ;;  %v699_v49 = vld [vmem:[#allocation5 + $0xb0] sm:$0xf] }
  0x1f   :  { %297 = vmatpush.bf16.msra.mxu1 %v716_v33  ;;  %v712_v50 = vor.u32 %v889_v42, %v709_v43  ;;  %v888_v51 = vld [vmem:[#allocation5 + $0xb4] sm:$0xf0]  ;;  %v871_v52 = vld [vmem:[#allocation5 + $0x34] sm:$0xf]  ;;  %v637_v53 = vld [vmem:[#allocation5 + $0x38] sm:$0xf0]  ;;  %v636_v56 = vor.u32 %v872_v48, %v635_v47 }
  0x20   :  { %310 = vmatpush.bf16.msra.mxu2 %v656_v34  ;;  %v887_v54 = vld [vmem:[#allocation5 + $0xb4] sm:$0xf]  ;;  %v701_v55 = vld [vmem:[#allocation5 + $0xb8] sm:$0xf0]  ;;  %v700_v57 = vor.u32 %v888_v51, %v699_v49  ;;  %v640_v58 = vor.u32 %v871_v52, %v637_v53  ;;  %v627_v59 = vld [vmem:[#allocation5 + $0x20] sm:$0xf] }
  0x21   :  { %323 = vmatpush.bf16.msra.mxu3 %v720_v38  ;;  %v870_v60 = vld [vmem:[#allocation5 + $0x24] sm:$0xf0]  ;;  %v691_v61 = vld [vmem:[#allocation5 + $0xa0] sm:$0xf]  ;;  %v704_v62 = vor.u32 %v887_v54, %v701_v55  ;;  %v869_v0 = vld [vmem:[#allocation5 + $0x24] sm:$0xf] }
  0x22   :  { %285 = vmatpush.bf16.msra.mxu0 %v644_v44  ;;  %v886_v63 = vld [vmem:[#allocation5 + $0xa4] sm:$0xf0]  ;;  %v629_v1 = vld [vmem:[#allocation5 + $0x28] sm:$0xf0]  ;;  %v885_v2 = vld [vmem:[#allocation5 + $0xa4] sm:$0xf]  ;;  %v628_v4 = vor.u32 %v870_v60, %v627_v59 }
  0x23   :  { %298 = vmatpush.bf16.msra.mxu1 %v708_v45  ;;  %v693_v3 = vld [vmem:[#allocation5 + $0xa8] sm:$0xf0]  ;;  %v692_v5 = vor.u32 %v886_v63, %v691_v61  ;;  %v632_v6 = vor.u32 %v869_v0, %v629_v1  ;;  %v619_v7 = vld [vmem:[#allocation5 + $0x10] sm:$0xf]  ;;  %v868_v8 = vld [vmem:[#allocation5 + $0x14] sm:$0xf0] }
  0x24   :  { %311 = vmatpush.bf16.msra.mxu2 %v648_v46  ;;  %v683_v9 = vld [vmem:[#allocation5 + $0x90] sm:$0xf]  ;;  %v696_v10 = vor.u32 %v885_v2, %v693_v3  ;;  %v884_v11 = vld [vmem:[#allocation5 + $0x94] sm:$0xf0]  ;;  %v867_v12 = vld [vmem:[#allocation5 + $0x14] sm:$0xf]  ;;  %v620_v16 = vor.u32 %v868_v8, %v619_v7 }
  0x25   :  { %324 = vmatpush.bf16.msra.mxu3 %v712_v50  ;;  %v621_v13 = vld [vmem:[#allocation5 + $0x18] sm:$0xf0]  ;;  %v883_v14 = vld [vmem:[#allocation5 + $0x94] sm:$0xf]  ;;  %v611_v17 = vld [vmem:[#allocation5] sm:$0xf]  ;;  %v684_v18 = vor.u32 %v884_v11, %v683_v9 }
  0x26   :  { %286 = vmatpush.bf16.msra.mxu0 %v636_v56  ;;  %v685_v15 = vld [vmem:[#allocation5 + $0x98] sm:$0xf0]  ;;  %v624_v19 = vor.u32 %v867_v12, %v621_v13  ;;  %v866_v20 = vld [vmem:[#allocation5 + $0x4] sm:$0xf0]  ;;  %v675_v21 = vld [vmem:[#allocation5 + $0x80] sm:$0xf] }
  0x27   :  { %299 = vmatpush.bf16.msra.mxu1 %v700_v57  ;;  %v882_v22 = vld [vmem:[#allocation5 + $0x84] sm:$0xf0]  ;;  %v688_v23 = vor.u32 %v883_v14, %v685_v15  ;;  %v865_v24 = vld [vmem:[#allocation5 + $0x4] sm:$0xf]  ;;  %v613_v25 = vld [vmem:[#allocation5 + $0x8] sm:$0xf0]  ;;  %v612_v30 = vor.u32 %v866_v20, %v611_v17 }
  0x28   :  { %312 = vmatpush.bf16.msra.mxu2 %v640_v58  ;;  %v881_v26 = vld [vmem:[#allocation5 + $0x84] sm:$0xf]  ;;  %v677_v27 = vld [vmem:[#allocation5 + $0x88] sm:$0xf0]  ;;  %v795_v28 = vld [vmem:[#allocation8 + $0x70] sm:$0xf]  ;;  %v676_v34 = vor.u32 %v882_v22, %v675_v21  ;;  %v616_v35 = vor.u32 %v865_v24, %v613_v25 }
  0x29   :  { %325 = vmatpush.bf16.msra.mxu3 %v704_v62  ;;  %v912_v29 = vld [vmem:[#allocation8 + $0x74] sm:$0xf0]  ;;  %v80_v31 = vld [vmem:[#allocation2] sm:$0xff]  ;;  %v797_v33 = vld [vmem:[#allocation8 + $0x78] sm:$0xf0]  ;;  %v680_v37 = vor.u32 %v881_v26, %v677_v27  ;;  %s1070_s13 = smov [#allocation10]  }
  0x2a   :  { %287 = vmatpush.bf16.msra.mxu0 %v628_v4  ;;  %v911_v32 = vld [vmem:[#allocation8 + $0x74] sm:$0xf]  ;;  %v796_v38 = vor.u32 %v912_v29, %v795_v28  ;;  %v787_v39 = vld [vmem:[#allocation8 + $0x60] sm:$0xf]  ;;  %v859_v40 = vld [vmem:[#allocation8 + $0xf0] sm:$0xf]  ;;  %v82_v42 = vpack.c.bf16 %v80_v31, %v80_v31 }
  0x2b   :  { %300 = vmatpush.bf16.msra.mxu1 %v692_v5  ;;  %v81_v36 = vld [vmem:[#allocation2 + $0x8] sm:$0xff]  ;;  %v800_v43 = vor.u32 %v911_v32, %v797_v33  ;;  %v910_v44 = vld [vmem:[#allocation8 + $0x64] sm:$0xf0]  ;;  %v909_v48 = vld [vmem:[#allocation8 + $0x64] sm:$0xf]  ;;  %s595_s14 = sshll.u32 %s1070_s13, 4  ;;  %s596_s14 = int_to_ptr.vmem [resolvable:$true] %s595_s14 }
  0x2c   :  { %313 = vmatpush.bf16.msra.mxu2 %v632_v6  ;;  %v928_v41 = vld [vmem:[#allocation8 + $0xf4] sm:$0xf0]  ;;  %v927_v45 = vld [vmem:[#allocation8 + $0xf4] sm:$0xf]  ;;  %v861_v46 = vld [vmem:[#allocation8 + $0xf8] sm:$0xf0]  ;;  %v83_v47 = vpack.c.bf16 %v81_v36, %v81_v36  ;;  %v788_v51 = vor.u32 %v910_v44, %v787_v39 }
  0x2d   :  { %326 = vmatpush.bf16.msra.mxu3 %v696_v10  ;;  %v789_v49 = vld [vmem:[#allocation8 + $0x68] sm:$0xf0]  ;;  %v860_v50 = vor.u32 %v928_v41, %v859_v40  ;;  %v864_v52 = vor.u32 %v927_v45, %v861_v46  ;;  %v779_v53 = vld [vmem:[#allocation8 + $0x50] sm:$0xf]  ;;  %v851_v54 = vld [vmem:[#allocation8 + $0xe0] sm:$0xf] }
  0x2e   :  { %288 = vmatpush.bf16.msra.mxu0 %v620_v16  ;;  %v926_v55 = vld [vmem:[#allocation8 + $0xe4] sm:$0xf0]  ;;  %v792_v56 = vor.u32 %v909_v48, %v789_v49  ;;  %v908_v57 = vld [vmem:[#allocation8 + $0x54] sm:$0xf0]  ;;  %v925_v58 = vld [vmem:[#allocation8 + $0xe4] sm:$0xf] }
  0x2f   :  { %301 = vmatpush.bf16.msra.mxu1 %v684_v18  ;;  %v853_v59 = vld [vmem:[#allocation8 + $0xe8] sm:$0xf0]  ;;  %v907_v60 = vld [vmem:[#allocation8 + $0x54] sm:$0xf]  ;;  %v781_v61 = vld [vmem:[#allocation8 + $0x58] sm:$0xf0]  ;;  %v852_v62 = vor.u32 %v926_v55, %v851_v54  ;;  %v780_v63 = vor.u32 %v908_v57, %v779_v53 }
  0x30   :  { %314 = vmatpush.bf16.msra.mxu2 %v624_v19  ;;  %v856_v0 = vor.u32 %v925_v58, %v853_v59  ;;  %v771_v1 = vld [vmem:[#allocation8 + $0x40] sm:$0xf]  ;;  %v843_v2 = vld [vmem:[#allocation8 + $0xd0] sm:$0xf]  ;;  %v924_v3 = vld [vmem:[#allocation8 + $0xd4] sm:$0xf0]  ;;  %v784_v4 = vor.u32 %v907_v60, %v781_v61 }
  0x31   :  { %327 = vmatpush.bf16.msra.mxu3 %v688_v23  ;;  %v906_v5 = vld [vmem:[#allocation8 + $0x44] sm:$0xf0]  ;;  %v923_v6 = vld [vmem:[#allocation8 + $0xd4] sm:$0xf]  ;;  %v845_v7 = vld [vmem:[#allocation8 + $0xd8] sm:$0xf0]  ;;  %v844_v10 = vor.u32 %v924_v3, %v843_v2 }
  0x32   :  { %289 = vmatpush.bf16.msra.mxu0 %v612_v30  ;;  %v905_v8 = vld [vmem:[#allocation8 + $0x44] sm:$0xf]  ;;  %v773_v9 = vld [vmem:[#allocation8 + $0x48] sm:$0xf0]  ;;  %v772_v11 = vor.u32 %v906_v5, %v771_v1  ;;  %v848_v12 = vor.u32 %v923_v6, %v845_v7  ;;  %v763_v13 = vld [vmem:[#allocation8 + $0x30] sm:$0xf] }
  0x33   :  { %302 = vmatpush.bf16.msra.mxu1 %v676_v34  ;;  %v835_v14 = vld [vmem:[#allocation8 + $0xc0] sm:$0xf]  ;;  %v922_v15 = vld [vmem:[#allocation8 + $0xc4] sm:$0xf0]  ;;  %v776_v16 = vor.u32 %v905_v8, %v773_v9  ;;  %v904_v17 = vld [vmem:[#allocation8 + $0x34] sm:$0xf0] }
  0x34   :  { %315 = vmatpush.bf16.msra.mxu2 %v616_v35  ;;  %v921_v18 = vld [vmem:[#allocation8 + $0xc4] sm:$0xf]  ;;  %v837_v19 = vld [vmem:[#allocation8 + $0xc8] sm:$0xf0]  ;;  %v903_v20 = vld [vmem:[#allocation8 + $0x34] sm:$0xf]  ;;  %v836_v22 = vor.u32 %v922_v15, %v835_v14  ;;  %v764_v23 = vor.u32 %v904_v17, %v763_v13 }
  0x35   :  { %328 = vmatpush.bf16.msra.mxu3 %v680_v37  ;;  %290 = vmatmul.bf16.vlgmr.msra.gmra.mxu0 %v82_v42  ;;  %v765_v21 = vld [vmem:[#allocation8 + $0x38] sm:$0xf0]  ;;  %v840_v24 = vor.u32 %v921_v18, %v837_v19  ;;  %v755_v26 = vld [vmem:[#allocation8 + $0x20] sm:$0xf]  ;;  %v902_v27 = vld [vmem:[#allocation8 + $0x24] sm:$0xf0] }
  0x36   :  { %536 = vmatpush.bf16.msrb.mxu0 %v796_v38  ;;  %303 = vmatmul.bf16.vlgmr.msra.gmra.mxu1 %v83_v47  ;;  %v768_v25 = vor.u32 %v903_v20, %v765_v21  ;;  %v901_v28 = vld [vmem:[#allocation8 + $0x24] sm:$0xf]  ;;  %v757_v29 = vld [vmem:[#allocation8 + $0x28] sm:$0xf0]  ;;  %v756_v30 = vor.u32 %v902_v27, %v755_v26  ;;  %v827_v32 = vld [vmem:[#allocation8 + $0xb0] sm:$0xf] }
  0x37   :  { %316 = vmatmul.bf16.vlgmr.msra.gmra.mxu2 %v82_v42  ;;  %549 = vmatpush.bf16.msrb.mxu1 %v860_v50  ;;  %v760_v31 = vor.u32 %v901_v28, %v757_v29  ;;  %v920_v33 = vld [vmem:[#allocation8 + $0xb4] sm:$0xf0]  ;;  %v919_v34 = vld [vmem:[#allocation8 + $0xb4] sm:$0xf]  ;;  %v829_v36 = vld [vmem:[#allocation8 + $0xb8] sm:$0xf0] }
  0x38   :  { %562 = vmatpush.bf16.msrb.mxu2 %v800_v43  ;;  %329 = vmatmul.bf16.vlgmr.msra.gmra.mxu3 %v83_v47  ;;  %v828_v35 = vor.u32 %v920_v33, %v827_v32  ;;  %v832_v37 = vor.u32 %v919_v34, %v829_v36  ;;  %v747_v38 = vld [vmem:[#allocation8 + $0x10] sm:$0xf]  ;;  %v900_v39 = vld [vmem:[#allocation8 + $0x14] sm:$0xf0]  ;;  %v899_v40 = vld [vmem:[#allocation8 + $0x14] sm:$0xf] }
  0x39   :  { %575 = vmatpush.bf16.msrb.mxu3 %v864_v52  ;;  %v748_v41 = vor.u32 %v900_v39, %v747_v38  ;;  %v749_v42 = vld [vmem:[#allocation8 + $0x18] sm:$0xf0]  ;;  %v819_v44 = vld [vmem:[#allocation8 + $0xa0] sm:$0xf]  ;;  %v918_v45 = vld [vmem:[#allocation8 + $0xa4] sm:$0xf0] }
  0x3a   :  { %537 = vmatpush.bf16.msrb.mxu0 %v788_v51  ;;  %v752_v43 = vor.u32 %v899_v40, %v749_v42  ;;  %v917_v46 = vld [vmem:[#allocation8 + $0xa4] sm:$0xf]  ;;  %v820_v47 = vor.u32 %v918_v45, %v819_v44  ;;  %v821_v48 = vld [vmem:[#allocation8 + $0xa8] sm:$0xf0]  ;;  %v739_v50 = vld [vmem:[#allocation8] sm:$0xf] }
  0x3b   :  { %550 = vmatpush.bf16.msrb.mxu1 %v852_v62  ;;  %v824_v49 = vor.u32 %v917_v46, %v821_v48  ;;  %v898_v51 = vld [vmem:[#allocation8 + $0x4] sm:$0xf0]  ;;  %v897_v52 = vld [vmem:[#allocation8 + $0x4] sm:$0xf]  ;;  %v741_v54 = vld [vmem:[#allocation8 + $0x8] sm:$0xf0] }
  0x3c   :  { %563 = vmatpush.bf16.msrb.mxu2 %v792_v56  ;;  %v740_v53 = vor.u32 %v898_v51, %v739_v50  ;;  %v744_v55 = vor.u32 %v897_v52, %v741_v54  ;;  %v811_v56 = vld [vmem:[#allocation8 + $0x90] sm:$0xf]  ;;  %v916_v57 = vld [vmem:[#allocation8 + $0x94] sm:$0xf0]  ;;  %v915_v59 = vld [vmem:[#allocation8 + $0x94] sm:$0xf] }
  0x3d   :  { %576 = vmatpush.bf16.msrb.mxu3 %v856_v0  ;;  %v812_v58 = vor.u32 %v916_v57, %v811_v56  ;;  %v813_v60 = vld [vmem:[#allocation8 + $0x98] sm:$0xf0]  ;;  %v803_v62 = vld [vmem:[#allocation8 + $0x80] sm:$0xf]  ;;  %v913_v0 = vld [vmem:[#allocation8 + $0x84] sm:$0xf] }
  0x3e   :  { %538 = vmatpush.bf16.msrb.mxu0 %v780_v63  ;;  %v816_v61 = vor.u32 %v915_v59, %v813_v60  ;;  %v914_v63 = vld [vmem:[#allocation8 + $0x84] sm:$0xf0]  ;;  %v805_v2 = vld [vmem:[#allocation8 + $0x88] sm:$0xf0]  ;;  %s597_s17 = sshll.u32 %s1124_s5, 4  ;;  %s598_s17 = int_to_ptr.hbm [resolvable:$true] %s597_s17 }
  0x3f   :  { %551 = vmatpush.bf16.msrb.mxu1 %v844_v10  ;;  %v804_v1 = vor.u32 %v914_v63, %v803_v62  ;;  %v808_v3 = vor.u32 %v913_v0, %v805_v2 }
  0x40   :  { %564 = vmatpush.bf16.msrb.mxu2 %v784_v4  ;;  %v116_v4 = vld [vmem:[#allocation7] sm:$0x3] }
  0x41   :  { %577 = vmatpush.bf16.msrb.mxu3 %v848_v12  ;;  %v118_v5 = vperm.slane %v116_v4, 0  ;;  %v119_v10 = vperm.slane %v116_v4, 1 }
  0x42   :  { %539 = vmatpush.bf16.msrb.mxu0 %v772_v11 }
  0x43   :  { %552 = vmatpush.bf16.msrb.mxu1 %v836_v22 }
  0x44   :  { %565 = vmatpush.bf16.msrb.mxu2 %v776_v16 }
  0x45   :  { %578 = vmatpush.bf16.msrb.mxu3 %v840_v24 }
  0x46   :  { %540 = vmatpush.bf16.msrb.mxu0 %v764_v23  ;;  %v370_v23 = vld [vmem:[%s1123_s4] sm:$0x3] }
  0x47   :  { %553 = vmatpush.bf16.msrb.mxu1 %v828_v35  ;;  %v372_v24 = vperm.slane %v370_v23, 0  ;;  %v373_v27 = vperm.slane %v370_v23, 1 }
  0x48   :  { %566 = vmatpush.bf16.msrb.mxu2 %v768_v25 }
  0x49   :  { %579 = vmatpush.bf16.msrb.mxu3 %v832_v37 }
  0x4a   :  { %541 = vmatpush.bf16.msrb.mxu0 %v756_v30 }
  0x4b   :  { %554 = vmatpush.bf16.msrb.mxu1 %v820_v47 }
  0x4c   :  { %567 = vmatpush.bf16.msrb.mxu2 %v760_v31 }
  0x4d   :  { %580 = vmatpush.bf16.msrb.mxu3 %v824_v49 }
  0x4e   :  { %542 = vmatpush.bf16.msrb.mxu0 %v748_v41 }
  0x4f   :  { %555 = vmatpush.bf16.msrb.mxu1 %v812_v58 }
  0x50   :  { %568 = vmatpush.bf16.msrb.mxu2 %v752_v43 }
  0x51   :  { %581 = vmatpush.bf16.msrb.mxu3 %v816_v61 }
  0x52   :  { %543 = vmatpush.bf16.msrb.mxu0 %v740_v53 }
  0x53   :  { %556 = vmatpush.bf16.msrb.mxu1 %v804_v1 }
  0x54   :  { %569 = vmatpush.bf16.msrb.mxu2 %v744_v55 }
  0x55   :  { %582 = vmatpush.bf16.msrb.mxu3 %v808_v3 }
  0xb2   :  { %v291_v6 = vpop.f32.mrf.mxu0 }
  0xb3   :  { %v292_v7 = vadd.f32 %v291_v6, %v118_v5  ;;  %v304_v8 = vpop.f32.mrf.mxu1 }
  0xb5   :  { %v305_v9 = vadd.f32 %v304_v8, %v292_v7 }
  0xb7   :  { %v334_v11 = vmax.f32 %v305_v9, 0.0 }
  0xb9   :  { %v336_v12 = vpack.c.bf16 %v334_v11, %v334_v11 }
  0xba   :  { %v317_v13 = vpop.f32.mrf.mxu2  ;;  %v293_v16 = vpop.f32.mrf.mxu0 }
  0xbb   :  { %v318_v14 = vadd.f32 %v317_v13, %v119_v10  ;;  %v330_v15 = vpop.f32.mrf.mxu3  ;;  %v306_v17 = vpop.f32.mrf.mxu1  ;;  %544 = vmatmul.bf16.vlgmr.msrb.gmra.mxu0 %v336_v12  ;;  %570 = vmatmul.bf16.vlgmr.msrb.gmra.mxu2 %v336_v12 }
  0xbd   :  { %v331_v18 = vadd.f32 %v330_v15, %v318_v14 }
  0xbf   :  { %v335_v19 = vmax.f32 %v331_v18, 0.0 }
  0xc1   :  { %v337_v20 = vpack.c.bf16 %v335_v19, %v335_v19 }
  0xc2   :  { %v319_v21 = vpop.f32.mrf.mxu2 }
  0xc3   :  { %v332_v22 = vpop.f32.mrf.mxu3  ;;  %557 = vmatmul.bf16.vlgmr.msrb.gmra.mxu1 %v337_v20  ;;  %583 = vmatmul.bf16.vlgmr.msrb.gmra.mxu3 %v337_v20 }
 0x138   :  { %v545_v25 = vpop.f32.mrf.mxu0 }
 0x139   :  { %v546_v26 = vadd.f32 %v545_v25, %v372_v24 }
 0x13e   :  { %v571_v28 = vpop.f32.mrf.mxu2 }
 0x13f   :  { %v572_v32 = vadd.f32 %v571_v28, %v373_v27 }
 0x140   :  { %v558_v29 = vpop.f32.mrf.mxu1  ;;  %v547_v31 = vpop.f32.mrf.mxu0 }
 0x141   :  { %v559_v30 = vadd.f32 %v558_v29, %v546_v26 }
 0x143   :  { %588 = vst [vmem:[#allocation10] sm:$0xff] %v559_v30 }
 0x146   :  { %v584_v33 = vpop.f32.mrf.mxu3  ;;  %v573_v35 = vpop.f32.mrf.mxu2 }
 0x147   :  { %v585_v34 = vadd.f32 %v584_v33, %v572_v32 }
 0x148   :  { %v560_v36 = vpop.f32.mrf.mxu1 }
 0x149   :  { %589 = vst [vmem:[#allocation10 + $0x8] sm:$0xff] %v585_v34 }
 0x14a   :  { %600 = dma.vmem_to_hbm [thread:$0]  %s596_s14, 256, %s598_s17, [#allocation4]  }
 0x14e   :  { %v586_v37 = vpop.f32.mrf.mxu3 }
 0x14f   :  { %1062 = dma.done.wait [#allocation4], 256  }
 0x150   :  { %1063 = vsyncadd [#allocation4], 4294967040 }
 0x151   :  { %605 = vsyncpa [#allocation3], 1 }
 0x152   :  { %606 = vsyncpa [#allocation6], 1 }
 0x153   :  { %607 = vsyncpa [#allocation9], 1 }
 0x154   :  { %608 = vsyncpa [#allocation4], 1 }

</bundles_post_ra>
